<compile_context>
chip_gen: v5e
topology: v5e:2x2
jax: 0.10.0
libtpu: 0.0.40
codegen_flags: <defaults>
</compile_context>

<pallas_src>
import jax
import jax.numpy as jnp
from jax.experimental import pallas as pl
from jax.experimental.pallas import tpu as pltpu


# ----------------------------------------------------------------------------
# Kernels
# ----------------------------------------------------------------------------

def _tnorm_kernel_affine(x_ref, gamma_ref, beta_ref, o_ref):
    # x block: (B_tile, T, NF_tile); reduction axis T is whole inside the block.
    x = x_ref[...].astype(jnp.float32)
    t = x.shape[1]
    # Single-pass sum / sum-of-squares (sublane reduce) -> no full-size diff temp.
    s = jnp.sum(x, axis=1, keepdims=True)                 # (Bt, 1, NFt)
    sq = jnp.sum(x * x, axis=1, keepdims=True)            # (Bt, 1, NFt)
    mean = s * (1.0 / t)
    # Unbiased variance; T == 1 gives 0/0 -> nan, matching torch.var(unbiased=True).
    var = (sq - mean * s) / jnp.float32(t - 1)
    inv = jax.lax.rsqrt(var + 1e-6)                       # EUP rsqrt, no VALU divide
    # Fold gamma / beta / mean into one scale & shift at reduced granularity so
    # the full-block sweep is a single fused mul+add per element.
    scale = inv * gamma_ref[...].astype(jnp.float32)      # (Bt, 1, NFt)
    shift = beta_ref[...].astype(jnp.float32) - mean * scale
    o_ref[...] = (x * scale + shift).astype(o_ref.dtype)


def _tnorm_kernel_noaffine(x_ref, o_ref):
    x = x_ref[...].astype(jnp.float32)
    t = x.shape[1]
    s = jnp.sum(x, axis=1, keepdims=True)
    sq = jnp.sum(x * x, axis=1, keepdims=True)
    mean = s * (1.0 / t)
    var = (sq - mean * s) / jnp.float32(t - 1)
    inv = jax.lax.rsqrt(var + 1e-6)
    shift = -mean * inv
    o_ref[...] = (x * inv + shift).astype(o_ref.dtype)


# ----------------------------------------------------------------------------
# Tiling heuristics (chip-aware)
# ----------------------------------------------------------------------------

def _vmem_capacity_bytes():
    try:
        cap = int(pltpu.get_tpu_info().vmem_capacity_bytes)
        if cap > 0:
            return cap
    except Exception:
        pass
    return 64 * 1024 * 1024  # conservative (v7x-sized) fallback


def _divisors_desc(n):
    return [d for d in range(n, 0, -1) if n % d == 0]


def _choose_tiles(B, T, NF, itemsize):
    """Pick (B_tile, NF_tile, vmem_limit_bytes).

    Block byte estimate = double-buffered in + out at the input dtype plus ~2
    full-size f32 temporaries (the f32 copy of x and the pre-cast result).
    Single-TC chips (v5e/v6e, 128 MiB VMEM) take the largest block that fits;
    the 2-TC chip (v7x, 64 MiB VMEM) prefers an even number of parallel steps
    so both TensorCores get work.
    """
    vmem_cap = _vmem_capacity_bytes()
    multi_tc = vmem_cap <= 64 * 1024 * 1024        # v7x proxy (2 TCs, 64 MiB)
    if multi_tc:
        budget = (vmem_cap * 3) // 8               # ~24 MiB on v7x
    else:
        budget = (vmem_cap * 5) // 8               # ~80 MiB on v5e/v6e
    vmem_limit = min(vmem_cap - (8 << 20), (vmem_cap * 13) // 16)

    per_elem = 4 * itemsize + 8                    # 2x(in+out) bufs + 2 f32 temps
    slab_elems = T * NF

    max_bt = budget // (per_elem * slab_elems) if slab_elems > 0 else 0
    if max_bt >= 1:
        fitting = [d for d in _divisors_desc(B) if d <= max_bt]
        bt = fitting[0] if fitting else 1
        if multi_tc:
            steps = B // bt
            if steps == 1 and B > 1:
                even = [d for d in fitting if (B // d) >= 2 and (B // d) % 2 == 0]
                ge2 = [d for d in fitting if (B // d) >= 2]
                bt = even[0] if even else (ge2[0] if ge2 else bt)
            elif steps > 1 and steps % 2 == 1:
                even = [d for d in fitting if (B // d) % 2 == 0]
                if even:
                    bt = even[0]
        nft = NF
        if multi_tc and (B // bt) == 1 and NF % 256 == 0:
            nft = NF // 2                          # grid (1, 2): one half per TC
        return bt, nft, vmem_limit

    # Single-batch slab exceeds the budget: tile the lane axis in multiples of
    # 128 that divide NF (T-reduction stays whole -> single-pass mean/var kept).
    nft = NF
    if NF % 128 == 0:
        best = 128
        for d in range(NF, 127, -128):
            if NF % d == 0 and per_elem * T * d <= budget:
                best = d
                break
        nft = best
    # else: NF not 128-divisible; keep whole NF and rely on vmem_limit headroom.
    return 1, nft, vmem_limit


# ----------------------------------------------------------------------------
# Wrapper
# ----------------------------------------------------------------------------

def tnorm(x, gamma=None, beta=None):
    """x: (B, T, N, F); gamma/beta: (1, 1, 1, F) or None (bias=False path)."""
    B, T, N, F = x.shape
    NF = N * F

    # Lane-dense layout: fold (N, F) into one last dim (free reshape on a
    # contiguous row-major array); full-width vst stores instead of vst.msk.
    x2 = x.reshape(B, T, NF)

    bt, nft, vmem_limit = _choose_tiles(B, T, NF, x.dtype.itemsize)
    gb, gj = B // bt, NF // nft

    # Deeper input pipelining only for the many-small-step NF fallback (v7x).
    use_buffered = (nft < NF) and (gj >= 4)

    if gj == 1:
        grid = (gb,)
        dims = ("parallel",)
        x_idx = lambda b: (b, 0, 0)
        p_idx = lambda b: (0, 0, 0)
    else:
        grid = (gb, gj)
        dims = ("parallel", "parallel")
        x_idx = lambda b, j: (b, 0, j)
        p_idx = lambda b, j: (0, 0, j)

    if use_buffered:
        x_spec = pl.BlockSpec((bt, T, nft), x_idx, pipeline_mode=pl.Buffered(3))
    else:
        x_spec = pl.BlockSpec((bt, T, nft), x_idx)
    o_spec = pl.BlockSpec((bt, T, nft), x_idx)
    p_spec = pl.BlockSpec((1, 1, nft), p_idx)

    if gamma is None:
        kernel = _tnorm_kernel_noaffine
        in_specs = [x_spec]
        args = (x2,)
    else:
        # gamma/beta broadcast over N; pre-tile once here (hoisted out of the
        # per-grid-step body).
        gamma_nf = jnp.broadcast_to(
            gamma.reshape(1, 1, 1, F).astype(jnp.float32), (1, 1, N, F)
        ).reshape(1, 1, NF)
        beta_nf = jnp.broadcast_to(
            beta.reshape(1, 1, 1, F).astype(jnp.float32), (1, 1, N, F)
        ).reshape(1, 1, NF)
        kernel = _tnorm_kernel_affine
        in_specs = [x_spec, p_spec, p_spec]
        args = (x2, gamma_nf, beta_nf)

    out2 = pl.pallas_call(
        kernel,
        out_shape=jax.ShapeDtypeStruct((B, T, NF), x.dtype),
        grid_spec=pltpu.PrefetchScalarGridSpec(
            num_scalar_prefetch=0,
            grid=grid,
            in_specs=in_specs,
            out_specs=o_spec,
        ),
        compiler_params=pltpu.CompilerParams(
            dimension_semantics=dims,
            vmem_limit_bytes=int(vmem_limit),
        ),
    )(*args)

    return out2.reshape(B, T, N, F)


# ----------------------------------------------------------------------------
# Pure-JAX reference
# ----------------------------------------------------------------------------

def tnorm_ref(x, gamma=None, beta=None):
    xf = x.astype(jnp.float32)
    mean = jnp.mean(xf, axis=-3, keepdims=True)
    var = jnp.var(xf, axis=-3, keepdims=True, ddof=1)   # unbiased
    x_norm = (xf - mean) / jnp.sqrt(var + 1e-6)
    if gamma is not None:
        x_norm = x_norm * gamma + beta
    return x_norm.astype(x.dtype)


if __name__ == "__main__":
    key = jax.random.PRNGKey(0)
    B, T, N, F = 2, 8, 16, 32          # feat_size = 32
    x = jax.random.normal(key, (B, T, N, F), dtype=jnp.float32)

    # Deterministic parameter init, matching nn.Module __init__ (bias=True path).
    gamma = jnp.ones((1, 1, 1, F), dtype=jnp.float32)
    beta = jnp.zeros((1, 1, 1, F), dtype=jnp.float32)

    out_affine = tnorm(x, gamma, beta)       # bias=True path
    out_plain = tnorm(x)                     # bias=False path (module default)
    jax.block_until_ready((out_affine, out_plain))

    ref_affine = tnorm_ref(x, gamma, beta)
    ref_plain = tnorm_ref(x)

    assert out_affine.shape == x.shape and out_affine.dtype == x.dtype
    assert jnp.allclose(out_affine, ref_affine, atol=1e-4, rtol=1e-4)
    assert jnp.allclose(out_plain, ref_plain, atol=1e-4, rtol=1e-4)
    print("KERNEL_OK")
</pallas_src>

<mosaic_0001>
module attributes {stable_mosaic.version = 11 : i64} {
  func.func @_tnorm_kernel_affine(%arg0: i32, %arg1: memref<1x8x512xf32, #tpu.memory_space<vmem>>, %arg2: memref<1x1x512xf32, #tpu.memory_space<vmem>>, %arg3: memref<1x1x512xf32, #tpu.memory_space<vmem>>, %arg4: memref<1x8x512xf32, #tpu.memory_space<vmem>>) attributes {dimension_semantics = [#tpu.dimension_semantics<parallel>], iteration_bounds = array<i64: 2>, scalar_prefetch = 0 : i64, scratch_operands = 0 : i64, tpu.core_type = #tpu.core_type<tc>, window_params = [{transform_indices = @transform_0, window_bounds = array<i64: 1, 8, 512>}, {pipeline_mode = #tpu.pipeline_mode<synchronous>, transform_indices = @transform_1, window_bounds = array<i64: 1, 1, 512>}, {pipeline_mode = #tpu.pipeline_mode<synchronous>, transform_indices = @transform_2, window_bounds = array<i64: 1, 1, 512>}, {transform_indices = @transform_3, window_bounds = array<i64: 1, 8, 512>}]} {
    %c0 = arith.constant 0 : index
    %c0_0 = arith.constant 0 : index
    %c0_1 = arith.constant 0 : index
    %0 = vector.load %arg1[%c0, %c0_0, %c0_1] : memref<1x8x512xf32, #tpu.memory_space<vmem>>, vector<1x8x512xf32>
    %cst = arith.constant dense<0.000000e+00> : vector<1x512xf32>
    %1 = vector.multi_reduction <add>, %0, %cst [1] : vector<1x8x512xf32> to vector<1x512xf32>
    %2 = vector.shape_cast %1 : vector<1x512xf32> to vector<1x1x512xf32>
    %3 = arith.mulf %0, %0 : vector<1x8x512xf32>
    %cst_2 = arith.constant dense<0.000000e+00> : vector<1x512xf32>
    %4 = vector.multi_reduction <add>, %3, %cst_2 [1] : vector<1x8x512xf32> to vector<1x512xf32>
    %5 = vector.shape_cast %4 : vector<1x512xf32> to vector<1x1x512xf32>
    %cst_3 = arith.constant 1.250000e-01 : f32
    %6 = vector.broadcast %cst_3 : f32 to vector<1x1x512xf32>
    %7 = arith.mulf %2, %6 : vector<1x1x512xf32>
    %8 = arith.mulf %7, %2 : vector<1x1x512xf32>
    %9 = arith.subf %5, %8 : vector<1x1x512xf32>
    %cst_4 = arith.constant 7.000000e+00 : f32
    %10 = vector.broadcast %cst_4 : f32 to vector<1x1x512xf32>
    %11 = arith.divf %9, %10 : vector<1x1x512xf32>
    %cst_5 = arith.constant 9.99999997E-7 : f32
    %12 = vector.broadcast %cst_5 : f32 to vector<1x1x512xf32>
    %13 = arith.addf %11, %12 : vector<1x1x512xf32>
    %14 = math.rsqrt %13 : vector<1x1x512xf32>
    %c0_6 = arith.constant 0 : index
    %c0_7 = arith.constant 0 : index
    %c0_8 = arith.constant 0 : index
    %15 = vector.load %arg2[%c0_6, %c0_7, %c0_8] : memref<1x1x512xf32, #tpu.memory_space<vmem>>, vector<1x1x512xf32>
    %16 = arith.mulf %14, %15 : vector<1x1x512xf32>
    %c0_9 = arith.constant 0 : index
    %c0_10 = arith.constant 0 : index
    %c0_11 = arith.constant 0 : index
    %17 = vector.load %arg3[%c0_9, %c0_10, %c0_11] : memref<1x1x512xf32, #tpu.memory_space<vmem>>, vector<1x1x512xf32>
    %18 = arith.mulf %7, %16 : vector<1x1x512xf32>
    %19 = arith.subf %17, %18 : vector<1x1x512xf32>
    %20 = vector.broadcast %16 : vector<1x1x512xf32> to vector<1x8x512xf32>
    %21 = arith.mulf %0, %20 : vector<1x8x512xf32>
    %22 = vector.broadcast %19 : vector<1x1x512xf32> to vector<1x8x512xf32>
    %23 = arith.addf %21, %22 : vector<1x8x512xf32>
    %c0_12 = arith.constant 0 : index
    %c0_13 = arith.constant 0 : index
    %c0_14 = arith.constant 0 : index
    %24 = vector.load %arg4[%c0_12, %c0_13, %c0_14] : memref<1x8x512xf32, #tpu.memory_space<vmem>>, vector<1x8x512xf32>
    tpu.vector_store %arg4[%c0_12, %c0_13, %c0_14], %23 {strides = array<i32>} : memref<1x8x512xf32, #tpu.memory_space<vmem>>, vector<1x8x512xf32>,
    return
  }
  func.func @transform_0(%arg0: i32) -> (i32, i32, i32) {
    %c0_i32 = arith.constant 0 : i32
    %c0_i32_0 = arith.constant 0 : i32
    %c0_i32_1 = arith.constant 0 : i32
    return %arg0, %c0_i32, %c0_i32_0 : i32, i32, i32
  }
  func.func @transform_1(%arg0: i32) -> (i32, i32, i32) {
    %c0_i32 = arith.constant 0 : i32
    %c0_i32_0 = arith.constant 0 : i32
    %c0_i32_1 = arith.constant 0 : i32
    %c0_i32_2 = arith.constant 0 : i32
    return %c0_i32, %c0_i32_0, %c0_i32_1 : i32, i32, i32
  }
  func.func @transform_2(%arg0: i32) -> (i32, i32, i32) {
    %c0_i32 = arith.constant 0 : i32
    %c0_i32_0 = arith.constant 0 : i32
    %c0_i32_1 = arith.constant 0 : i32
    %c0_i32_2 = arith.constant 0 : i32
    return %c0_i32, %c0_i32_0, %c0_i32_1 : i32, i32, i32
  }
  func.func @transform_3(%arg0: i32) -> (i32, i32, i32) {
    %c0_i32 = arith.constant 0 : i32
    %c0_i32_0 = arith.constant 0 : i32
    %c0_i32_1 = arith.constant 0 : i32
    return %arg0, %c0_i32, %c0_i32_0 : i32, i32, i32
  }
}

</mosaic_0001>

<bundles_post_ra>
// kernel: tpu_custom_call.1
= control target key start
LH: loop header
LB: loop body
LE: loop exit
PB: predicated region body
PF: predicated region fallthrough
CT: control target
= control target key end

     0   :  { %8 = vsyncpa [#allocation3], 0  ;;  %s984_s0 = inlined_call_operand.hbm [shape: f32[2,8,512], index: 0, kind: input, shape index: {}]   ;;  %s985_s1 = inlined_call_operand.hbm [shape: f32[1,1,512], index: 1, kind: input, shape index: {}]   ;;  %s986_s2 = inlined_call_operand.hbm [shape: f32[1,1,512], index: 2, kind: input, shape index: {}]   ;;  %s987_s3 = inlined_call_operand.hbm [shape: f32[2,8,512], index: 3, kind: output, shape index: {}]  }
   0x1   :  { %10 = vsyncpa [#allocation3 + $0x1], 0 }
   0x2   :  { %11 = vsyncpa [#allocation6], 0 }
   0x3   :  { %12 = vsyncpa [#allocation4], 0 }
   0x4   :  { %14 = vsyncpa [#allocation4 + $0x1], 0  ;;  %s789_s12 = smov 0   ;;  %s791_s13 = smov 0  }
   0x5   :  { %s793_s14 = smov 0   ;;  %s795_s15 = smov 0  }
   0x6 LB: > { %s810_s16 = sadd.s32 4294967295, %s764_s15   ;;  %s506_s17 = sadd.s32 4294967294, %s764_s15   ;;  %s764_s15 = sphi %s795_s15, %s999_s15   ;;  %s760_s14 = sphi %s793_s14, %s998_s14   ;;  %s756_s13 = sphi %s791_s13, %s997_s13   ;;  %s752_s12 = sphi %s789_s12, %s996_s12  }
   0x7   : > { %p40_p0 = scmp.ne.s32.totalorder %s756_s13, %s752_s12  ;;  %p41_p1 = scmp.eq.s32.totalorder %s810_s16, 0 }
   0x8   : > { %p106_p2 = scmp.eq.s32.totalorder %s810_s16, 1  ;;  %p112_p3 = scmp.eq.s32.totalorder %s506_s17, 1 }
   0x9   : > { %p819_p4 = por %p41_p1, %p40_p0  ;;  %p507_p5 = scmp.ge.s32.totalorder %s764_s15, 1 }
   0xa   : > { %p824_p6 = por %p112_p3, %p40_p0  ;;  %p119_p7 = scmp.lt.s32.totalorder %s764_s15, 3 }
   0xb   : > { %s131_s22 = sshll.u32 %s985_s1, 4  ;;  %s766_s24 = smov [#allocation5]   ;;  %s132_s22 = int_to_ptr.hbm [resolvable:$true] %s131_s22 }
   0xc   : > { %p832_p8 = pnand %p507_p5, %p119_p7  ;;  %s133_s25 = sshll.u32 %s766_s24, 4  ;;  %s134_s25 = int_to_ptr.vmem [resolvable:$true] %s133_s25 }
   0xd   : > { %s143_s28 = sshll.u32 %s986_s2, 4  ;;  %s767_s29 = smov [#allocation7]   ;;  %s144_s28 = int_to_ptr.hbm [resolvable:$true] %s143_s28 }
   0xe   : > { %p538_p10 = pneg %p832_p8  ;;  %s145_s30 = sshll.u32 %s767_s29, 4  ;;  %s146_s30 = int_to_ptr.vmem [resolvable:$true] %s145_s30 }
   0xf   : > { %s845_s4 = sadd.s32 1, %s764_s15   ;;  %s27_s5 = sadd.s32 1, %s760_s14 }
  0x10   : > { %p539_p11 = pnand %p538_p10, %p41_p1  ;;  %s24_s6 = ssub.s32 %s764_s15, %s845_s4 }
  0x11   : > { %p34_p12 = scmp.ne.s32.totalorder %s760_s14, %s756_s13  ;;  %p25_p13 = scmp.eq.s32.totalorder %s24_s6, 0 }
  0x12   : > { %541 = dma.hbm_to_vmem [thread:$0]  (!%p539_p11), %s132_s22, 64, %s134_s25, [#allocation6]  }
  0x13   : > { %544 = dma.hbm_to_vmem [thread:$0]  (!%p539_p11), %s144_s28, 64, %s146_s30, [#allocation6]  }
  0x14   : > { %p35_p0 = scmp.eq.s32.totalorder %s764_s15, 0  ;;  %p855_p3 = por %p106_p2, %p34_p12 }
  0x15   : > { %p555_p5 = scmp.lt.s32.totalorder %s764_s15, 2  ;;  %s156_s9 = sand.u32 1, %s760_s14  }
  0x16   : > { %s861_s8 = scalar_select %p25_p13, %s760_s14, %s27_s5  }
  0x17   : > { %p36_p7 = por %p35_p0, %p34_p12  ;;  %s511_s10 = sshll.u32 %s156_s9, 5 }
  0x18   : > { %s524_s11 = sshll.u32 %s764_s15, 5  ;;  %s160_s22 = scalar_lea.vmem [#allocation2], %s511_s10 }
  0x19   : > { %s165_s21 = scalar_lea.hbm %s984_s0, %s524_s11  ;;  %s169_s24 = sshll.u32 %s160_s22, 4  ;;  %s170_s24 = int_to_ptr.vmem [resolvable:$true] %s169_s24 }
  0x1a   : > { %s167_s25 = sshll.u32 %s165_s21, 4  ;;  %p868_p2 = pnand %p555_p5, %p36_p7  ;;  %s168_s25 = int_to_ptr.hbm [resolvable:$true] %s167_s25 }
  0x1b   : > { %s157_s27 = scalar_lea.sflag [#allocation3], %s156_s9  ;;  %s664_s28 = sshra.s32 %s168_s25, 4  ;;  %s665_s28 = int_to_ptr.hbm [resolvable:$true] %s664_s28 }
  0x1c   : > { %s666_s29 = scalar_lea.hbm %s665_s28, 32  ;;  %p668_p11 = pneg %p868_p2 }
  0x1d   : > { %p667_p10 = scmp.ne.s32.totalorder %s665_s28, %s666_s29  ;;  %s671_s6 = scalar_lea.hbm %s984_s0, 64 }
  0x1e   : > { %p672_p0 = scmp.lt.s32.totalorder %s665_s28, %s984_s0  ;;  %p673_p5 = scmp.lt.s32.totalorder %s671_s6, %s666_s29 }
  0x1f   : > { %p669_p12 = pnand %p668_p11, %p667_p10 }
  0x20   : > { %p674_p7 = por %p673_p5, %p672_p0 }
  0x21   : > { %p670_p13 = pneg %p669_p12 }
  0x23   : > { %p675_p9 = pnand %p674_p7, %p670_p13 }
  0x25   : > { %678 = shalt.err (!%p675_p9)
}
  0x26   : > { %548 = dma.hbm_to_vmem [thread:$0]  (!%p868_p2), %s168_s25, 512, %s170_s24, %s157_s27  }
  0x27   : > { %178 = sbr.rel (%p832_p8) target bundleno = 116 (0x74), region = 32  ;;  %s885_s9 = sand.u32 (!%p832_p8), 1, %s756_s13  }
  0x28   : > { %s515_s17 = sshll.u32 (!%p832_p8), %s885_s9, 5  ;;  %s181_s20 = scalar_lea.sflag (!%p832_p8), [#allocation3], %s885_s9 }
  0x29   : > { %s184_s21 = scalar_lea.vmem (!%p832_p8), [#allocation2], %s515_s17 }
  0x2c   : > { %739 = dma.done.wait (%p819_p4), %s181_s20, 512  }
  0x2d   : > { %741 = vsyncadd (%p819_p4), %s181_s20, 4294966784 }
  0x2e   : > { %743 = dma.done.wait (%p41_p1), [#allocation6], 128  }
  0x2f   : > { %745 = vsyncadd (%p41_p1), [#allocation6], 4294967168  ;;  %v899_v0 = vld [vmem:[%s184_s21] sm:$0xff]  ;;  %v901_v1 = vld [vmem:[%s184_s21 + $0x8] sm:$0xff]  ;;  %v768_v3 = vmov 7.0   ;;  %vm367_vm13 = vcmask 1040384  }
  0x30   : > { %v903_v2 = vld [vmem:[%s184_s21 + $0x10] sm:$0xff]  ;;  %594 = vrcp.f32 %v768_v3  ;;  %v905_v4 = vld [vmem:[%s184_s21 + $0x18] sm:$0xff]  ;;  %v222_v5 = vrot.slane %v899_v0, 4  ;;  %v228_v6 = vrot.slane %v901_v1, 4  ;;  %v246_v8 = vmul.f32 %v899_v0, %v899_v0  ;;  %s525_s18 = sshll.u32 %s810_s16, 5  ;;  %s217_s16 = scalar_lea.vmem [#allocation8], %s515_s17 }
  0x31   : > { %v234_v7 = vrot.slane %v903_v2, 4  ;;  %v240_v9 = vrot.slane %v905_v4, 4  ;;  %v247_v10 = vmul.f32 %v901_v1, %v901_v1  ;;  %v248_v11 = vmul.f32 %v903_v2, %v903_v2  ;;  %s412_s24 = scalar_lea.hbm %s987_s3, %s525_s18  ;;  %s414_s25 = sshll.u32 %s217_s16, 4  ;;  %s415_s25 = int_to_ptr.vmem [resolvable:$true] %s414_s25 }
  0x32   : > { %v249_v12 = vmul.f32 %v905_v4, %v905_v4  ;;  %v223_v13 = vadd.f32 %v222_v5, %v899_v0  ;;  %v229_v14 = vadd.f32 %v228_v6, %v901_v1  ;;  %v250_v16 = vrot.slane %v246_v8, 4  ;;  %s416_s26 = sshll.u32 %s412_s24, 4  ;;  %s401_s27 = scalar_lea.sflag [#allocation4], %s885_s9  ;;  %s417_s26 = int_to_ptr.hbm [resolvable:$true] %s416_s26 }
  0x33   : > { %v235_v15 = vadd.f32 %v234_v7, %v903_v2  ;;  %v241_v17 = vadd.f32 %v240_v9, %v905_v4  ;;  %v256_v18 = vrot.slane %v247_v10, 4  ;;  %v262_v19 = vrot.slane %v248_v11, 4  ;;  %s708_s28 = sshra.s32 %s417_s26, 4  ;;  %s714_s6 = scalar_lea.hbm %s987_s3, 64  ;;  %s709_s28 = int_to_ptr.hbm [resolvable:$true] %s708_s28 }
  0x34   : > { %v268_v20 = vrot.slane %v249_v12, 4  ;;  %v224_v21 = vrot.slane %v223_v13, 2  ;;  %v230_v22 = vrot.slane %v229_v14, 2  ;;  %v251_v24 = vadd.f32 %v250_v16, %v246_v8  ;;  %s710_s29 = scalar_lea.hbm %s709_s28, 32  ;;  %p715_p9 = scmp.lt.s32.totalorder %s709_s28, %s987_s3 }
  0x35   : > { %v236_v23 = vrot.slane %v235_v15, 2  ;;  %v242_v26 = vrot.slane %v241_v17, 2  ;;  %v257_v27 = vadd.f32 %v256_v18, %v247_v10  ;;  %v263_v28 = vadd.f32 %v262_v19, %v248_v11  ;;  %p711_p1 = scmp.ne.s32.totalorder %s709_s28, %s710_s29  ;;  %p716_p2 = scmp.lt.s32.totalorder %s714_s6, %s710_s29 }
  0x36   : > { %v595_v25 = vpop.eup %594  ;;  %v269_v29 = vadd.f32 %v268_v20, %v249_v12  ;;  %v225_v30 = vadd.f32 %v224_v21, %v223_v13  ;;  %v231_v31 = vadd.f32 %v230_v22, %v229_v14  ;;  %v252_v33 = vrot.slane %v251_v24, 2 }
  0x37   : > { %v237_v32 = vadd.f32 %v236_v23, %v235_v15  ;;  %v243_v34 = vadd.f32 %v242_v26, %v241_v17  ;;  %v258_v35 = vrot.slane %v257_v27, 2  ;;  %v264_v36 = vrot.slane %v263_v28, 2  ;;  %p712_p4 = pnand %p711_p1, %p855_p3  ;;  %p717_p10 = por %p716_p2, %p715_p9 }
  0x38   : > { %v270_v37 = vrot.slane %v269_v29, 2  ;;  %v226_v38 = vrot.slane %v225_v30, 1  ;;  %v232_v39 = vrot.slane %v231_v31, 1  ;;  %v253_v41 = vadd.f32 %v252_v33, %v251_v24 }
  0x39   : > { %v238_v40 = vrot.slane %v237_v32, 1  ;;  %v244_v42 = vrot.slane %v243_v34, 1  ;;  %v259_v43 = vadd.f32 %v258_v35, %v257_v27  ;;  %v265_v44 = vadd.f32 %v264_v36, %v263_v28  ;;  %p713_p8 = pneg %p712_p4 }
  0x3a   : > { %v271_v45 = vadd.f32 %v270_v37, %v269_v29  ;;  %v227_v46 = vadd.f32 %v226_v38, %v225_v30  ;;  %v233_v47 = vadd.f32 %v232_v39, %v231_v31  ;;  %v254_v49 = vrot.slane %v253_v41, 1  ;;  %v341_v31 = vld [vmem:[#allocation5] sm:$0xf] }
  0x3b   : > { %v239_v48 = vadd.f32 %v238_v40, %v237_v32  ;;  %v245_v50 = vadd.f32 %v244_v42, %v243_v34  ;;  %v260_v51 = vrot.slane %v259_v43, 1  ;;  %v266_v52 = vrot.slane %v265_v44, 1  ;;  %p718_p11 = pnand %p717_p10, %p713_p8 }
  0x3c   : > { %v272_v53 = vrot.slane %v271_v45, 1  ;;  %v923_v54 = vmul.f32 0.125, %v227_v46  ;;  %v925_v55 = vmul.f32 0.125, %v233_v47  ;;  %v255_v57 = vadd.f32 %v254_v49, %v253_v41 }
  0x3d   : > { %v927_v56 = vmul.f32 0.125, %v239_v48  ;;  %v929_v58 = vmul.f32 0.125, %v245_v50  ;;  %v261_v59 = vadd.f32 %v260_v51, %v259_v43  ;;  %v267_v60 = vadd.f32 %v266_v52, %v265_v44 }
  0x3e   : > { %v273_v61 = vadd.f32 %v272_v53, %v271_v45  ;;  %v287_v62 = vmul.f32 7.0, %v595_v25  ;;  %v278_v63 = vmul.f32 %v923_v54, %v227_v46  ;;  %v279_v3 = vmul.f32 %v925_v55, %v233_v47 }
  0x3f   : > { %v280_v5 = vmul.f32 %v927_v56, %v239_v48  ;;  %v281_v6 = vmul.f32 %v929_v58, %v245_v50  ;;  %vm291_vm0 = vweird.f32 %v595_v25  ;;  %v343_v34 = vperm.slane %v341_v31, 0 }
  0x40   : > { %v288_v7 = vsub.f32 1.0, %v287_v62  ;;  %v282_v9 = vsub.f32 %v255_v57, %v278_v63  ;;  %v283_v10 = vsub.f32 %v261_v59, %v279_v3  ;;  %v344_v46 = vperm.slane %v341_v31, 1 }
  0x41   : > { %v284_v11 = vsub.f32 %v267_v60, %v280_v5  ;;  %v285_v12 = vsub.f32 %v273_v61, %v281_v6  ;;  %v345_v49 = vperm.slane %v341_v31, 2  ;;  %v346_v52 = vperm.slane %v341_v31, 3 }
  0x42   : > { %v289_v8 = vmul.f32 %v595_v25, %v288_v7  ;;  %vm369_vm14 = vcmask 1042434   ;;  %vm371_vm15 = vcmask 1041408  }
  0x44   : > { %v290_v13 = vadd.f32 %v595_v25, %v289_v8 }
  0x46   : > { %v292_v14 = vsel %vm291_vm0, %v595_v25, %v290_v13 }
  0x47   : > { %v293_v15 = vmul.f32 %v292_v14, %v282_v9  ;;  %v294_v16 = vmul.f32 %v292_v14, %v283_v10  ;;  %v295_v17 = vmul.f32 %v292_v14, %v284_v11  ;;  %v296_v18 = vmul.f32 %v292_v14, %v285_v12 }
  0x49   : > { %v297_v19 = vadd.f32 1e-06, %v293_v15  ;;  %v298_v20 = vadd.f32 1e-06, %v294_v16  ;;  %v299_v21 = vadd.f32 1e-06, %v295_v17 }
  0x4a   : > { %v300_v22 = vadd.f32 1e-06, %v296_v18  ;;  %v355_v16 = vld [vmem:[#allocation7] sm:$0xf] }
  0x4b   : > { %596 = vrsqrt.f32 %v297_v19  ;;  %vm307_vm1 = vweird.f32 %v297_v19  ;;  %vm317_vm3 = vweird.f32 %v298_v20  ;;  %vm327_vm5 = vweird.f32 %v299_v21 }
  0x4c   : > { %598 = vrsqrt.f32 %v298_v20  ;;  %vm337_vm8 = vweird.f32 %v300_v22 }
  0x4d   : > { %600 = vrsqrt.f32 %v299_v21 }
  0x4e   : > { %602 = vrsqrt.f32 %v300_v22 }
  0x51   : > { %v597_v23 = vpop.eup %596 }
  0x52   : > { %v599_v24 = vpop.eup %598  ;;  %v302_v26 = vmul.f32 %v597_v23, %v297_v19  ;;  %vm308_vm2 = vweird.f32 %v597_v23 }
  0x53   : > { %v601_v27 = vpop.eup %600  ;;  %v312_v28 = vmul.f32 %v599_v24, %v298_v20  ;;  %vm318_vm4 = vweird.f32 %v599_v24  ;;  %vm935_vm7 = vmor %vm307_vm1, %vm308_vm2 }
  0x54   : > { %v603_v29 = vpop.eup %602  ;;  %v303_v30 = vmul.f32 %v597_v23, %v302_v26  ;;  %v322_v25 = vmul.f32 %v601_v27, %v299_v21  ;;  %vm328_vm6 = vweird.f32 %v601_v27  ;;  %vm319_vm10 = vmor %vm317_vm3, %vm318_vm4 }
  0x55   : > { %v313_v32 = vmul.f32 %v599_v24, %v312_v28  ;;  %v332_v33 = vmul.f32 %v603_v29, %v300_v22  ;;  %vm338_vm9 = vweird.f32 %v603_v29  ;;  %vm329_vm11 = vmor %vm327_vm5, %vm328_vm6 }
  0x56   : > { %v304_v35 = vmul.f32 0.5, %v303_v30  ;;  %v323_v36 = vmul.f32 %v601_v27, %v322_v25  ;;  %vm339_vm12 = vmor %vm337_vm8, %vm338_vm9 }
  0x57   : > { %v314_v37 = vmul.f32 0.5, %v313_v32  ;;  %v333_v38 = vmul.f32 %v603_v29, %v332_v33 }
  0x58   : > { %v305_v39 = vsub.f32 1.5, %v304_v35  ;;  %v324_v40 = vmul.f32 0.5, %v323_v36 }
  0x59   : > { %v315_v42 = vsub.f32 1.5, %v314_v37  ;;  %v334_v43 = vmul.f32 0.5, %v333_v38 }
  0x5a   : > { %v306_v44 = vmul.f32 %v597_v23, %v305_v39  ;;  %v325_v45 = vsub.f32 1.5, %v324_v40 }
  0x5b   : > { %v316_v47 = vmul.f32 %v599_v24, %v315_v42  ;;  %v335_v48 = vsub.f32 1.5, %v334_v43 }
  0x5c   : > { %v310_v50 = vsel %vm935_vm7, %v597_v23, %v306_v44  ;;  %v326_v51 = vmul.f32 %v601_v27, %v325_v45 }
  0x5d   : > { %v320_v53 = vsel %vm319_vm10, %v599_v24, %v316_v47  ;;  %v336_v57 = vmul.f32 %v603_v29, %v335_v48  ;;  %v351_v59 = vmul.f32 %v343_v34, %v310_v50 }
  0x5e   : > { %v330_v60 = vsel %vm329_vm11, %v601_v27, %v326_v51  ;;  %v352_v61 = vmul.f32 %v344_v46, %v320_v53 }
  0x5f   : > { %v340_v62 = vsel %vm339_vm12, %v603_v29, %v336_v57  ;;  %v353_v63 = vmul.f32 %v345_v49, %v330_v60  ;;  %v356_v5 = vmul.f32 %v351_v59, %v923_v54  ;;  %v375_v11 = vperm.slane %v351_v59, 0 }
  0x60   : > { %v354_v3 = vmul.f32 %v346_v52, %v340_v62  ;;  %v357_v6 = vmul.f32 %v352_v61, %v925_v55  ;;  %v376_v14 = vperm.slane %v352_v61, 0 }
  0x61   : > { %v358_v7 = vmul.f32 %v353_v63, %v927_v56  ;;  %v377_v15 = vperm.slane %v353_v63, 0  ;;  %v379_v56 = vmul.f32 %v375_v11, %v899_v0 }
  0x62   : > { %v359_v8 = vmul.f32 %v354_v3, %v929_v58  ;;  %v364_v9 = vrot.slane %v357_v6, 7  ;;  %v378_v54 = vperm.slane %v354_v3, 0  ;;  %v380_v58 = vmul.f32 %v376_v14, %v901_v1 }
  0x63   : > { %v365_v10 = vrot.slane %v358_v7, 6  ;;  %v381_v19 = vmul.f32 %v377_v15, %v903_v2 }
  0x64   : > { %v366_v12 = vrot.slane %v359_v8, 5  ;;  %v368_v13 = vsel %vm367_vm13, %v356_v5, %v364_v9  ;;  %v382_v20 = vmul.f32 %v378_v54, %v905_v4 }
  0x66   : > { %v370_v17 = vsel %vm369_vm14, %v365_v10, %v366_v12 }
  0x67   : > { %v372_v55 = vsel %vm371_vm15, %v368_v13, %v370_v17 }
  0x68   : > { %v374_v18 = vsub.f32 %v355_v16, %v372_v55 }
  0x6a   : > { %v384_v21 = vperm.slane %v374_v18, 0  ;;  %v385_v22 = vperm.slane %v374_v18, 1  ;;  %v386_v23 = vperm.slane %v374_v18, 2  ;;  %v387_v24 = vperm.slane %v374_v18, 3 }
  0x6c   : > { %v392_v26 = vadd.f32 %v384_v21, %v379_v56  ;;  %v393_v0 = vadd.f32 %v385_v22, %v380_v58  ;;  %v394_v1 = vadd.f32 %v386_v23, %v381_v19  ;;  %v395_v2 = vadd.f32 %v387_v24, %v382_v20 }
  0x6e   : > { %396 = vst [vmem:[%s217_s16] sm:$0xff] %v392_v26 }
  0x6f   : > { %397 = vst [vmem:[%s217_s16 + $0x8] sm:$0xff] %v393_v0 }
  0x70   : > { %398 = vst [vmem:[%s217_s16 + $0x10] sm:$0xff] %v394_v1 }
  0x71   : > { %399 = vst [vmem:[%s217_s16 + $0x18] sm:$0xff] %v395_v2 }
  0x72   : > { %721 = shalt.err (!%p718_p11)
}
  0x73   : > { %536 = dma.vmem_to_hbm [thread:$0]  (%p855_p3), %s415_s25, 512, %s417_s26, %s401_s27  }
  0x74 PF: > { %s428_s9 = sand.u32 1, %s752_s12   ;;  %p995_p12 = scmp.ge.s32.totalorder %s764_s15, 2 }
  0x75   : > { %s429_s17 = scalar_lea.sflag [#allocation4], %s428_s9 }
  0x76   : > { %p550_p13 = pnand %p995_p12, %p824_p6 }
  0x78   : > { %p551_p0 = pneg %p550_p13 }
  0x7a   : > { %747 = dma.done.wait (%p551_p0), %s429_s17, 512  }
  0x7b   : > { %749 = vsyncadd (%p551_p0), %s429_s17, 4294966784  ;;  %p17_p5 = scmp.ge.s32.totalorder %s845_s4, 4   ;;  %s996_s12 = smov %s756_s13 }
  0x7c   : > { %s997_s13 = smov %s760_s14  ;;  %s998_s14 = smov %s861_s8 }
  0x7d   : > { %s999_s15 = smov %s845_s4  ;;  %19 = sbr.rel (!%p17_p5) target bundleno = 6 (0x6), region = 85 }
  0x82   :  { %435 = vsyncpa [#allocation3], 1 }
  0x83   :  { %437 = vsyncpa [#allocation3 + $0x1], 1 }
  0x84   :  { %438 = vsyncpa [#allocation6], 1 }
  0x85   :  { %439 = vsyncpa [#allocation4], 1 }
  0x86   :  { %441 = vsyncpa [#allocation4 + $0x1], 1 }

</bundles_post_ra>
